<compile_context>
chip_gen: v5e
topology: v5e:2x2
jax: 0.10.0
libtpu: 0.0.40
codegen_flags: <defaults>
</compile_context>

<pallas_src>
import functools

import jax
import jax.numpy as jnp
from jax import lax
from jax.experimental import pallas as pl
from jax.experimental.pallas import tpu as pltpu


def _attention_kernel(x_ref, wqkv_ref, bqkv_ref, w1_ref, b1_ref, o_ref, pv_ref,
                      *, heads, head_dim):
    """One grid step == one batch element (all heads processed inside).

    Refs (VMEM):
      x_ref    : (1, n, dim)    bf16 input tokens
      wqkv_ref : (dim, 3*dim)   bf16 fused [Wq^T | Wk^T | Wv^T], scale folded into Wq cols
      bqkv_ref : (1, 3*dim)     f32 fused bias (scale folded into q part)
      w1_ref   : (dim, dim)     bf16 W1^T (rows in (h d) order)
      b1_ref   : (1, dim)       f32
      o_ref    : (1, n, dim)    f32 output (written exactly once)
      pv_ref   : (n, dim)       bf16 scratch holding all heads' attention outputs
    """
    _, n, dim = x_ref.shape
    d = head_dim

    x = x_ref[0]                                                    # (n, dim) bf16

    # One wide fused QKV GEMM (full MXU depth & lane fill), f32 accumulate,
    # f32 bias add, then a single cast back to bf16 for the MXU inputs below.
    qkv = (jnp.dot(x, wqkv_ref[...], preferred_element_type=jnp.float32)
           + bqkv_ref[...]).astype(jnp.bfloat16)                    # (n, 3*dim)

    # Static unroll over heads: all slice offsets are Python ints.
    for h in range(heads):
        q = qkv[:, h * d:(h + 1) * d]                               # (n, d) bf16 (scaled)
        k = qkv[:, dim + h * d:dim + (h + 1) * d]                   # (n, d) bf16
        v = qkv[:, 2 * dim + h * d:2 * dim + (h + 1) * d]           # (n, d) bf16

        # Scores q @ k^T without materializing a transpose (NT dot_general).
        dots = lax.dot_general(
            q, k, dimension_numbers=(((1,), (1,)), ((), ())),
            preferred_element_type=jnp.float32)                     # (n, n) f32

        # Softmax in f32 (VPU/EUP); approx reciprocal -> EUP vrcp slot.
        m = jnp.max(dots, axis=-1, keepdims=True)
        e = jnp.exp(dots - m)
        p = e * pl.reciprocal(jnp.sum(e, axis=-1, keepdims=True), approx=True)

        pv = jnp.dot(p.astype(jnp.bfloat16), v,
                     preferred_element_type=jnp.float32)            # (n, d) f32

        # Park this head's output at its static column offset in the scratch.
        pv_ref[:, h * d:(h + 1) * d] = pv.astype(jnp.bfloat16)

    # Deferred output projection: ONE full-depth GEMM (n,dim)@(dim,dim),
    # bias add, single store of the output block.
    out = jnp.dot(pv_ref[...], w1_ref[...],
                  preferred_element_type=jnp.float32) + b1_ref[...]
    o_ref[0] = out.astype(o_ref.dtype)


def prepare_attention_params(wqkv, bqkv, w1, b1, *, heads):
    """Host-side, once-per-model weight prep (hoisted out of the forward path).

    wqkv: (3*dim, dim), bqkv: (3*dim,), w1: (dim, dim), b1: (dim,) in PyTorch
    nn.Linear (out, in) layout.
    """
    three_dim, dim = wqkv.shape
    assert three_dim == 3 * dim and dim % heads == 0
    scale = dim ** (-0.5)

    # Fold the softmax scale into the q columns / q bias. Ship MXU weights
    # bf16 (after scaling), biases stay f32.
    col_scale = jnp.concatenate(
        [jnp.full((dim,), scale, jnp.float32), jnp.ones((2 * dim,), jnp.float32)])
    wqkv_t = (wqkv.T.astype(jnp.float32) * col_scale[None, :]).astype(jnp.bfloat16)
    bqkv_s = (bqkv.astype(jnp.float32) * col_scale).reshape(1, 3 * dim)

    # y = out @ W1^T + b1 with `out` columns in (h d) order.
    w1_t = w1.T.astype(jnp.bfloat16)                                # (dim, dim)
    b1_2d = b1.astype(jnp.float32).reshape(1, dim)

    return {"wqkv_t": wqkv_t, "bqkv": bqkv_s, "w1_t": w1_t, "b1": b1_2d}


def attention_forward(x, params, *, heads):
    """x: (b, n, dim) f32; params from prepare_attention_params."""
    b, n, dim = x.shape
    d = dim // heads
    x_b = x.astype(jnp.bfloat16)     # bf16 activations over the wire / in VMEM

    kernel = functools.partial(_attention_kernel, heads=heads, head_dim=d)

    return pl.pallas_call(
        kernel,
        out_shape=jax.ShapeDtypeStruct((b, n, dim), jnp.float32),
        grid_spec=pltpu.PrefetchScalarGridSpec(
            num_scalar_prefetch=0,
            grid=(b,),
            in_specs=[
                pl.BlockSpec((1, n, dim), lambda i: (i, 0, 0)),      # x (bf16)
                pl.BlockSpec((dim, 3 * dim), lambda i: (0, 0)),      # Wqkv^T, grid-resident
                pl.BlockSpec((1, 3 * dim), lambda i: (0, 0)),        # bqkv, grid-resident
                pl.BlockSpec((dim, dim), lambda i: (0, 0)),          # W1^T, grid-resident
                pl.BlockSpec((1, dim), lambda i: (0, 0)),            # b1, grid-resident
            ],
            out_specs=pl.BlockSpec((1, n, dim), lambda i: (i, 0, 0)),
            scratch_shapes=[pltpu.VMEM((n, dim), jnp.bfloat16)],     # per-head pv slab
        ),
        compiler_params=pltpu.CompilerParams(
            dimension_semantics=("parallel",)),
    )(x_b, params["wqkv_t"], params["bqkv"], params["w1_t"], params["b1"])


def reference_forward(x, wqkv, bqkv, w1, b1, *, heads):
    """Pure-JAX f32 reference mirroring the PyTorch forward (eval mode)."""
    b, n, dim = x.shape
    d = dim // heads
    scale = dim ** (-0.5)
    qkv = x @ wqkv.T + bqkv                                  # (b, n, 3*dim)
    q, k, v = jnp.split(qkv, 3, axis=-1)

    def to_heads(t):                                         # b n (h d) -> b h n d
        return t.reshape(b, n, heads, d).transpose(0, 2, 1, 3)

    q, k, v = map(to_heads, (q, k, v))
    dots = jnp.einsum('bhid,bhjd->bhij', q, k) * scale
    attn = jax.nn.softmax(dots, axis=-1)
    out = jnp.einsum('bhij,bhjd->bhid', attn, v)
    out = out.transpose(0, 2, 1, 3).reshape(b, n, dim)       # b h n d -> b n (h d)
    return out @ w1.T + b1


if __name__ == "__main__":
    # Small shapes consistent with the module: dim divisible by heads=8.
    batch, seq, dim, heads = 2, 8, 32, 8

    key = jax.random.PRNGKey(0)
    kx, k1, k2, k3, k4 = jax.random.split(key, 5)

    x = jax.random.normal(kx, (batch, seq, dim), dtype=jnp.float32)

    # Deterministic parameter init, PyTorch nn.Linear layout (out, in).
    bound = 1.0 / (dim ** 0.5)
    wqkv = jax.random.uniform(k1, (3 * dim, dim), jnp.float32, -bound, bound)
    bqkv = jax.random.uniform(k2, (3 * dim,), jnp.float32, -bound, bound)
    w1 = jax.random.uniform(k3, (dim, dim), jnp.float32, -bound, bound)
    b1 = jax.random.uniform(k4, (dim,), jnp.float32, -bound, bound)

    # Weight prep runs once (load time), not per forward call.
    params = prepare_attention_params(wqkv, bqkv, w1, b1, heads=heads)

    out = attention_forward(x, params, heads=heads)
    out = jax.block_until_ready(out)

    ref = reference_forward(x, wqkv, bqkv, w1, b1, heads=heads)
    assert out.shape == (batch, seq, dim)
    # bf16 MXU inputs with f32 accumulation vs f32 reference -> loose-ish tol.
    assert jnp.allclose(out, ref, atol=3e-2, rtol=3e-2), (
        float(jnp.max(jnp.abs(out - ref))))

    print("KERNEL_OK")
</pallas_src>

<mosaic_0001>
module attributes {stable_mosaic.version = 11 : i64} {
  func.func @_attention_kernel(%arg0: i32, %arg1: memref<1x8x32xbf16, #tpu.memory_space<vmem>>, %arg2: memref<32x96xbf16, #tpu.memory_space<vmem>>, %arg3: memref<1x96xf32, #tpu.memory_space<vmem>>, %arg4: memref<32x32xbf16, #tpu.memory_space<vmem>>, %arg5: memref<1x32xf32, #tpu.memory_space<vmem>>, %arg6: memref<1x8x32xf32, #tpu.memory_space<vmem>>, %arg7: memref<8x32xbf16, #tpu.memory_space<vmem>>) attributes {dimension_semantics = [#tpu.dimension_semantics<parallel>], iteration_bounds = array<i64: 2>, scalar_prefetch = 0 : i64, scratch_operands = 1 : i64, tpu.core_type = #tpu.core_type<tc>, window_params = [{transform_indices = @transform_0, window_bounds = array<i64: 1, 8, 32>}, {pipeline_mode = #tpu.pipeline_mode<synchronous>, transform_indices = @transform_1, window_bounds = array<i64: 32, 96>}, {pipeline_mode = #tpu.pipeline_mode<synchronous>, transform_indices = @transform_2, window_bounds = array<i64: 1, 96>}, {pipeline_mode = #tpu.pipeline_mode<synchronous>, transform_indices = @transform_3, window_bounds = array<i64: 32, 32>}, {pipeline_mode = #tpu.pipeline_mode<synchronous>, transform_indices = @transform_4, window_bounds = array<i64: 1, 32>}, {transform_indices = @transform_5, window_bounds = array<i64: 1, 8, 32>}]} {
    %c0 = arith.constant 0 : index
    %c0_0 = arith.constant 0 : index
    %c0_1 = arith.constant 0 : index
    %0 = vector.load %arg1[%c0, %c0_0, %c0_1] : memref<1x8x32xbf16, #tpu.memory_space<vmem>>, vector<1x8x32xbf16>
    %1 = vector.shape_cast %0 : vector<1x8x32xbf16> to vector<8x32xbf16>
    %c0_2 = arith.constant 0 : index
    %c0_3 = arith.constant 0 : index
    %2 = vector.load %arg2[%c0_2, %c0_3] : memref<32x96xbf16, #tpu.memory_space<vmem>>, vector<32x96xbf16>
    %cst = arith.constant dense<0.000000e+00> : vector<8x96xf32>
    %3 = tpu.matmul %1, %2, %cst {dimension_numbers = #tpu.dot_dimension_numbers<[1], [0], [0], [1], [0, 0, 1, 1], [], []>} : vector<8x32xbf16>, vector<32x96xbf16>, vector<8x96xf32> -> vector<8x96xf32>
    %c0_4 = arith.constant 0 : index
    %c0_5 = arith.constant 0 : index
    %4 = vector.load %arg3[%c0_4, %c0_5] : memref<1x96xf32, #tpu.memory_space<vmem>>, vector<1x96xf32>
    %5 = vector.broadcast %4 : vector<1x96xf32> to vector<8x96xf32>
    %6 = arith.addf %3, %5 : vector<8x96xf32>
    %7 = arith.truncf %6 : vector<8x96xf32> to vector<8x96xbf16>
    %8 = vector.extract_strided_slice %7 {offsets = [0, 0], sizes = [8, 4], strides = [1, 1]} : vector<8x96xbf16> to vector<8x4xbf16>
    %9 = vector.extract_strided_slice %7 {offsets = [0, 32], sizes = [8, 4], strides = [1, 1]} : vector<8x96xbf16> to vector<8x4xbf16>
    %10 = vector.extract_strided_slice %7 {offsets = [0, 64], sizes = [8, 4], strides = [1, 1]} : vector<8x96xbf16> to vector<8x4xbf16>
    %cst_6 = arith.constant dense<0.000000e+00> : vector<8x8xf32>
    %11 = tpu.matmul %8, %9, %cst_6 {dimension_numbers = #tpu.dot_dimension_numbers<[1], [1], [0], [0], [0, 0, 1, 0], [], []>} : vector<8x4xbf16>, vector<8x4xbf16>, vector<8x8xf32> -> vector<8x8xf32>
    %cst_7 = arith.constant dense<0xFF800000> : vector<8xf32>
    %12 = vector.multi_reduction <maximumf>, %11, %cst_7 [1] : vector<8x8xf32> to vector<8xf32>
    %13 = vector.shape_cast %12 : vector<8xf32> to vector<8x1xf32>
    %14 = vector.broadcast %13 : vector<8x1xf32> to vector<8x8xf32>
    %15 = arith.subf %11, %14 : vector<8x8xf32>
    %16 = math.exp %15 : vector<8x8xf32>
    %cst_8 = arith.constant dense<0.000000e+00> : vector<8xf32>
    %17 = vector.multi_reduction <add>, %16, %cst_8 [1] : vector<8x8xf32> to vector<8xf32>
    %18 = vector.shape_cast %17 : vector<8xf32> to vector<8x1xf32>
    %19 = tpu.reciprocal %18 {approx = true} : vector<8x1xf32> -> vector<8x1xf32>
    %20 = vector.broadcast %19 : vector<8x1xf32> to vector<8x8xf32>
    %21 = arith.mulf %16, %20 : vector<8x8xf32>
    %22 = arith.truncf %21 : vector<8x8xf32> to vector<8x8xbf16>
    %cst_9 = arith.constant dense<0.000000e+00> : vector<8x4xf32>
    %23 = tpu.matmul %22, %10, %cst_9 {dimension_numbers = #tpu.dot_dimension_numbers<[1], [0], [0], [1], [0, 0, 1, 1], [], []>} : vector<8x8xbf16>, vector<8x4xbf16>, vector<8x4xf32> -> vector<8x4xf32>
    %24 = arith.truncf %23 : vector<8x4xf32> to vector<8x4xbf16>
    %c0_10 = arith.constant 0 : index
    %c0_11 = arith.constant 0 : index
    %25 = vector.load %arg7[%c0_10, %c0_11] : memref<8x32xbf16, #tpu.memory_space<vmem>>, vector<8x4xbf16>
    tpu.vector_store %arg7[%c0_10, %c0_11], %24 {strides = array<i32>} : memref<8x32xbf16, #tpu.memory_space<vmem>>, vector<8x4xbf16>,
    %26 = vector.extract_strided_slice %7 {offsets = [0, 4], sizes = [8, 4], strides = [1, 1]} : vector<8x96xbf16> to vector<8x4xbf16>
    %27 = vector.extract_strided_slice %7 {offsets = [0, 36], sizes = [8, 4], strides = [1, 1]} : vector<8x96xbf16> to vector<8x4xbf16>
    %28 = vector.extract_strided_slice %7 {offsets = [0, 68], sizes = [8, 4], strides = [1, 1]} : vector<8x96xbf16> to vector<8x4xbf16>
    %cst_12 = arith.constant dense<0.000000e+00> : vector<8x8xf32>
    %29 = tpu.matmul %26, %27, %cst_12 {dimension_numbers = #tpu.dot_dimension_numbers<[1], [1], [0], [0], [0, 0, 1, 0], [], []>} : vector<8x4xbf16>, vector<8x4xbf16>, vector<8x8xf32> -> vector<8x8xf32>
    %cst_13 = arith.constant dense<0xFF800000> : vector<8xf32>
    %30 = vector.multi_reduction <maximumf>, %29, %cst_13 [1] : vector<8x8xf32> to vector<8xf32>
    %31 = vector.shape_cast %30 : vector<8xf32> to vector<8x1xf32>
    %32 = vector.broadcast %31 : vector<8x1xf32> to vector<8x8xf32>
    %33 = arith.subf %29, %32 : vector<8x8xf32>
    %34 = math.exp %33 : vector<8x8xf32>
    %cst_14 = arith.constant dense<0.000000e+00> : vector<8xf32>
    %35 = vector.multi_reduction <add>, %34, %cst_14 [1] : vector<8x8xf32> to vector<8xf32>
    %36 = vector.shape_cast %35 : vector<8xf32> to vector<8x1xf32>
    %37 = tpu.reciprocal %36 {approx = true} : vector<8x1xf32> -> vector<8x1xf32>
    %38 = vector.broadcast %37 : vector<8x1xf32> to vector<8x8xf32>
    %39 = arith.mulf %34, %38 : vector<8x8xf32>
    %40 = arith.truncf %39 : vector<8x8xf32> to vector<8x8xbf16>
    %cst_15 = arith.constant dense<0.000000e+00> : vector<8x4xf32>
    %41 = tpu.matmul %40, %28, %cst_15 {dimension_numbers = #tpu.dot_dimension_numbers<[1], [0], [0], [1], [0, 0, 1, 1], [], []>} : vector<8x8xbf16>, vector<8x4xbf16>, vector<8x4xf32> -> vector<8x4xf32>
    %42 = arith.truncf %41 : vector<8x4xf32> to vector<8x4xbf16>
    %c0_16 = arith.constant 0 : index
    %c4 = arith.constant 4 : index
    %43 = vector.load %arg7[%c0_16, %c4] : memref<8x32xbf16, #tpu.memory_space<vmem>>, vector<8x4xbf16>
    tpu.vector_store %arg7[%c0_16, %c4], %42 {strides = array<i32>} : memref<8x32xbf16, #tpu.memory_space<vmem>>, vector<8x4xbf16>,
    %44 = vector.extract_strided_slice %7 {offsets = [0, 8], sizes = [8, 4], strides = [1, 1]} : vector<8x96xbf16> to vector<8x4xbf16>
    %45 = vector.extract_strided_slice %7 {offsets = [0, 40], sizes = [8, 4], strides = [1, 1]} : vector<8x96xbf16> to vector<8x4xbf16>
    %46 = vector.extract_strided_slice %7 {offsets = [0, 72], sizes = [8, 4], strides = [1, 1]} : vector<8x96xbf16> to vector<8x4xbf16>
    %cst_17 = arith.constant dense<0.000000e+00> : vector<8x8xf32>
    %47 = tpu.matmul %44, %45, %cst_17 {dimension_numbers = #tpu.dot_dimension_numbers<[1], [1], [0], [0], [0, 0, 1, 0], [], []>} : vector<8x4xbf16>, vector<8x4xbf16>, vector<8x8xf32> -> vector<8x8xf32>
    %cst_18 = arith.constant dense<0xFF800000> : vector<8xf32>
    %48 = vector.multi_reduction <maximumf>, %47, %cst_18 [1] : vector<8x8xf32> to vector<8xf32>
    %49 = vector.shape_cast %48 : vector<8xf32> to vector<8x1xf32>
    %50 = vector.broadcast %49 : vector<8x1xf32> to vector<8x8xf32>
    %51 = arith.subf %47, %50 : vector<8x8xf32>
    %52 = math.exp %51 : vector<8x8xf32>
    %cst_19 = arith.constant dense<0.000000e+00> : vector<8xf32>
    %53 = vector.multi_reduction <add>, %52, %cst_19 [1] : vector<8x8xf32> to vector<8xf32>
    %54 = vector.shape_cast %53 : vector<8xf32> to vector<8x1xf32>
    %55 = tpu.reciprocal %54 {approx = true} : vector<8x1xf32> -> vector<8x1xf32>
    %56 = vector.broadcast %55 : vector<8x1xf32> to vector<8x8xf32>
    %57 = arith.mulf %52, %56 : vector<8x8xf32>
    %58 = arith.truncf %57 : vector<8x8xf32> to vector<8x8xbf16>
    %cst_20 = arith.constant dense<0.000000e+00> : vector<8x4xf32>
    %59 = tpu.matmul %58, %46, %cst_20 {dimension_numbers = #tpu.dot_dimension_numbers<[1], [0], [0], [1], [0, 0, 1, 1], [], []>} : vector<8x8xbf16>, vector<8x4xbf16>, vector<8x4xf32> -> vector<8x4xf32>
    %60 = arith.truncf %59 : vector<8x4xf32> to vector<8x4xbf16>
    %c0_21 = arith.constant 0 : index
    %c8 = arith.constant 8 : index
    %61 = vector.load %arg7[%c0_21, %c8] : memref<8x32xbf16, #tpu.memory_space<vmem>>, vector<8x4xbf16>
    tpu.vector_store %arg7[%c0_21, %c8], %60 {strides = array<i32>} : memref<8x32xbf16, #tpu.memory_space<vmem>>, vector<8x4xbf16>,
    %62 = vector.extract_strided_slice %7 {offsets = [0, 12], sizes = [8, 4], strides = [1, 1]} : vector<8x96xbf16> to vector<8x4xbf16>
    %63 = vector.extract_strided_slice %7 {offsets = [0, 44], sizes = [8, 4], strides = [1, 1]} : vector<8x96xbf16> to vector<8x4xbf16>
    %64 = vector.extract_strided_slice %7 {offsets = [0, 76], sizes = [8, 4], strides = [1, 1]} : vector<8x96xbf16> to vector<8x4xbf16>
    %cst_22 = arith.constant dense<0.000000e+00> : vector<8x8xf32>
    %65 = tpu.matmul %62, %63, %cst_22 {dimension_numbers = #tpu.dot_dimension_numbers<[1], [1], [0], [0], [0, 0, 1, 0], [], []>} : vector<8x4xbf16>, vector<8x4xbf16>, vector<8x8xf32> -> vector<8x8xf32>
    %cst_23 = arith.constant dense<0xFF800000> : vector<8xf32>
    %66 = vector.multi_reduction <maximumf>, %65, %cst_23 [1] : vector<8x8xf32> to vector<8xf32>
    %67 = vector.shape_cast %66 : vector<8xf32> to vector<8x1xf32>
    %68 = vector.broadcast %67 : vector<8x1xf32> to vector<8x8xf32>
    %69 = arith.subf %65, %68 : vector<8x8xf32>
    %70 = math.exp %69 : vector<8x8xf32>
    %cst_24 = arith.constant dense<0.000000e+00> : vector<8xf32>
    %71 = vector.multi_reduction <add>, %70, %cst_24 [1] : vector<8x8xf32> to vector<8xf32>
    %72 = vector.shape_cast %71 : vector<8xf32> to vector<8x1xf32>
    %73 = tpu.reciprocal %72 {approx = true} : vector<8x1xf32> -> vector<8x1xf32>
    %74 = vector.broadcast %73 : vector<8x1xf32> to vector<8x8xf32>
    %75 = arith.mulf %70, %74 : vector<8x8xf32>
    %76 = arith.truncf %75 : vector<8x8xf32> to vector<8x8xbf16>
    %cst_25 = arith.constant dense<0.000000e+00> : vector<8x4xf32>
    %77 = tpu.matmul %76, %64, %cst_25 {dimension_numbers = #tpu.dot_dimension_numbers<[1], [0], [0], [1], [0, 0, 1, 1], [], []>} : vector<8x8xbf16>, vector<8x4xbf16>, vector<8x4xf32> -> vector<8x4xf32>
    %78 = arith.truncf %77 : vector<8x4xf32> to vector<8x4xbf16>
    %c0_26 = arith.constant 0 : index
    %c12 = arith.constant 12 : index
    %79 = vector.load %arg7[%c0_26, %c12] : memref<8x32xbf16, #tpu.memory_space<vmem>>, vector<8x4xbf16>
    tpu.vector_store %arg7[%c0_26, %c12], %78 {strides = array<i32>} : memref<8x32xbf16, #tpu.memory_space<vmem>>, vector<8x4xbf16>,
    %80 = vector.extract_strided_slice %7 {offsets = [0, 16], sizes = [8, 4], strides = [1, 1]} : vector<8x96xbf16> to vector<8x4xbf16>
    %81 = vector.extract_strided_slice %7 {offsets = [0, 48], sizes = [8, 4], strides = [1, 1]} : vector<8x96xbf16> to vector<8x4xbf16>
    %82 = vector.extract_strided_slice %7 {offsets = [0, 80], sizes = [8, 4], strides = [1, 1]} : vector<8x96xbf16> to vector<8x4xbf16>
    %cst_27 = arith.constant dense<0.000000e+00> : vector<8x8xf32>
    %83 = tpu.matmul %80, %81, %cst_27 {dimension_numbers = #tpu.dot_dimension_numbers<[1], [1], [0], [0], [0, 0, 1, 0], [], []>} : vector<8x4xbf16>, vector<8x4xbf16>, vector<8x8xf32> -> vector<8x8xf32>
    %cst_28 = arith.constant dense<0xFF800000> : vector<8xf32>
    %84 = vector.multi_reduction <maximumf>, %83, %cst_28 [1] : vector<8x8xf32> to vector<8xf32>
    %85 = vector.shape_cast %84 : vector<8xf32> to vector<8x1xf32>
    %86 = vector.broadcast %85 : vector<8x1xf32> to vector<8x8xf32>
    %87 = arith.subf %83, %86 : vector<8x8xf32>
    %88 = math.exp %87 : vector<8x8xf32>
    %cst_29 = arith.constant dense<0.000000e+00> : vector<8xf32>
    %89 = vector.multi_reduction <add>, %88, %cst_29 [1] : vector<8x8xf32> to vector<8xf32>
    %90 = vector.shape_cast %89 : vector<8xf32> to vector<8x1xf32>
    %91 = tpu.reciprocal %90 {approx = true} : vector<8x1xf32> -> vector<8x1xf32>
    %92 = vector.broadcast %91 : vector<8x1xf32> to vector<8x8xf32>
    %93 = arith.mulf %88, %92 : vector<8x8xf32>
    %94 = arith.truncf %93 : vector<8x8xf32> to vector<8x8xbf16>
    %cst_30 = arith.constant dense<0.000000e+00> : vector<8x4xf32>
    %95 = tpu.matmul %94, %82, %cst_30 {dimension_numbers = #tpu.dot_dimension_numbers<[1], [0], [0], [1], [0, 0, 1, 1], [], []>} : vector<8x8xbf16>, vector<8x4xbf16>, vector<8x4xf32> -> vector<8x4xf32>
    %96 = arith.truncf %95 : vector<8x4xf32> to vector<8x4xbf16>
    %c0_31 = arith.constant 0 : index
    %c16 = arith.constant 16 : index
    %97 = vector.load %arg7[%c0_31, %c16] : memref<8x32xbf16, #tpu.memory_space<vmem>>, vector<8x4xbf16>
    tpu.vector_store %arg7[%c0_31, %c16], %96 {strides = array<i32>} : memref<8x32xbf16, #tpu.memory_space<vmem>>, vector<8x4xbf16>,
    %98 = vector.extract_strided_slice %7 {offsets = [0, 20], sizes = [8, 4], strides = [1, 1]} : vector<8x96xbf16> to vector<8x4xbf16>
    %99 = vector.extract_strided_slice %7 {offsets = [0, 52], sizes = [8, 4], strides = [1, 1]} : vector<8x96xbf16> to vector<8x4xbf16>
    %100 = vector.extract_strided_slice %7 {offsets = [0, 84], sizes = [8, 4], strides = [1, 1]} : vector<8x96xbf16> to vector<8x4xbf16>
    %cst_32 = arith.constant dense<0.000000e+00> : vector<8x8xf32>
    %101 = tpu.matmul %98, %99, %cst_32 {dimension_numbers = #tpu.dot_dimension_numbers<[1], [1], [0], [0], [0, 0, 1, 0], [], []>} : vector<8x4xbf16>, vector<8x4xbf16>, vector<8x8xf32> -> vector<8x8xf32>
    %cst_33 = arith.constant dense<0xFF800000> : vector<8xf32>
    %102 = vector.multi_reduction <maximumf>, %101, %cst_33 [1] : vector<8x8xf32> to vector<8xf32>
    %103 = vector.shape_cast %102 : vector<8xf32> to vector<8x1xf32>
    %104 = vector.broadcast %103 : vector<8x1xf32> to vector<8x8xf32>
    %105 = arith.subf %101, %104 : vector<8x8xf32>
    %106 = math.exp %105 : vector<8x8xf32>
    %cst_34 = arith.constant dense<0.000000e+00> : vector<8xf32>
    %107 = vector.multi_reduction <add>, %106, %cst_34 [1] : vector<8x8xf32> to vector<8xf32>
    %108 = vector.shape_cast %107 : vector<8xf32> to vector<8x1xf32>
    %109 = tpu.reciprocal %108 {approx = true} : vector<8x1xf32> -> vector<8x1xf32>
    %110 = vector.broadcast %109 : vector<8x1xf32> to vector<8x8xf32>
    %111 = arith.mulf %106, %110 : vector<8x8xf32>
    %112 = arith.truncf %111 : vector<8x8xf32> to vector<8x8xbf16>
    %cst_35 = arith.constant dense<0.000000e+00> : vector<8x4xf32>
    %113 = tpu.matmul %112, %100, %cst_35 {dimension_numbers = #tpu.dot_dimension_numbers<[1], [0], [0], [1], [0, 0, 1, 1], [], []>} : vector<8x8xbf16>, vector<8x4xbf16>, vector<8x4xf32> -> vector<8x4xf32>
    %114 = arith.truncf %113 : vector<8x4xf32> to vector<8x4xbf16>
    %c0_36 = arith.constant 0 : index
    %c20 = arith.constant 20 : index
    %115 = vector.load %arg7[%c0_36, %c20] : memref<8x32xbf16, #tpu.memory_space<vmem>>, vector<8x4xbf16>
    tpu.vector_store %arg7[%c0_36, %c20], %114 {strides = array<i32>} : memref<8x32xbf16, #tpu.memory_space<vmem>>, vector<8x4xbf16>,
    %116 = vector.extract_strided_slice %7 {offsets = [0, 24], sizes = [8, 4], strides = [1, 1]} : vector<8x96xbf16> to vector<8x4xbf16>
    %117 = vector.extract_strided_slice %7 {offsets = [0, 56], sizes = [8, 4], strides = [1, 1]} : vector<8x96xbf16> to vector<8x4xbf16>
    %118 = vector.extract_strided_slice %7 {offsets = [0, 88], sizes = [8, 4], strides = [1, 1]} : vector<8x96xbf16> to vector<8x4xbf16>
    %cst_37 = arith.constant dense<0.000000e+00> : vector<8x8xf32>
    %119 = tpu.matmul %116, %117, %cst_37 {dimension_numbers = #tpu.dot_dimension_numbers<[1], [1], [0], [0], [0, 0, 1, 0], [], []>} : vector<8x4xbf16>, vector<8x4xbf16>, vector<8x8xf32> -> vector<8x8xf32>
    %cst_38 = arith.constant dense<0xFF800000> : vector<8xf32>
    %120 = vector.multi_reduction <maximumf>, %119, %cst_38 [1] : vector<8x8xf32> to vector<8xf32>
    %121 = vector.shape_cast %120 : vector<8xf32> to vector<8x1xf32>
    %122 = vector.broadcast %121 : vector<8x1xf32> to vector<8x8xf32>
    %123 = arith.subf %119, %122 : vector<8x8xf32>
    %124 = math.exp %123 : vector<8x8xf32>
    %cst_39 = arith.constant dense<0.000000e+00> : vector<8xf32>
    %125 = vector.multi_reduction <add>, %124, %cst_39 [1] : vector<8x8xf32> to vector<8xf32>
    %126 = vector.shape_cast %125 : vector<8xf32> to vector<8x1xf32>
    %127 = tpu.reciprocal %126 {approx = true} : vector<8x1xf32> -> vector<8x1xf32>
    %128 = vector.broadcast %127 : vector<8x1xf32> to vector<8x8xf32>
    %129 = arith.mulf %124, %128 : vector<8x8xf32>
    %130 = arith.truncf %129 : vector<8x8xf32> to vector<8x8xbf16>
    %cst_40 = arith.constant dense<0.000000e+00> : vector<8x4xf32>
    %131 = tpu.matmul %130, %118, %cst_40 {dimension_numbers = #tpu.dot_dimension_numbers<[1], [0], [0], [1], [0, 0, 1, 1], [], []>} : vector<8x8xbf16>, vector<8x4xbf16>, vector<8x4xf32> -> vector<8x4xf32>
    %132 = arith.truncf %131 : vector<8x4xf32> to vector<8x4xbf16>
    %c0_41 = arith.constant 0 : index
    %c24 = arith.constant 24 : index
    %133 = vector.load %arg7[%c0_41, %c24] : memref<8x32xbf16, #tpu.memory_space<vmem>>, vector<8x4xbf16>
    tpu.vector_store %arg7[%c0_41, %c24], %132 {strides = array<i32>} : memref<8x32xbf16, #tpu.memory_space<vmem>>, vector<8x4xbf16>,
    %134 = vector.extract_strided_slice %7 {offsets = [0, 28], sizes = [8, 4], strides = [1, 1]} : vector<8x96xbf16> to vector<8x4xbf16>
    %135 = vector.extract_strided_slice %7 {offsets = [0, 60], sizes = [8, 4], strides = [1, 1]} : vector<8x96xbf16> to vector<8x4xbf16>
    %136 = vector.extract_strided_slice %7 {offsets = [0, 92], sizes = [8, 4], strides = [1, 1]} : vector<8x96xbf16> to vector<8x4xbf16>
    %cst_42 = arith.constant dense<0.000000e+00> : vector<8x8xf32>
    %137 = tpu.matmul %134, %135, %cst_42 {dimension_numbers = #tpu.dot_dimension_numbers<[1], [1], [0], [0], [0, 0, 1, 0], [], []>} : vector<8x4xbf16>, vector<8x4xbf16>, vector<8x8xf32> -> vector<8x8xf32>
    %cst_43 = arith.constant dense<0xFF800000> : vector<8xf32>
    %138 = vector.multi_reduction <maximumf>, %137, %cst_43 [1] : vector<8x8xf32> to vector<8xf32>
    %139 = vector.shape_cast %138 : vector<8xf32> to vector<8x1xf32>
    %140 = vector.broadcast %139 : vector<8x1xf32> to vector<8x8xf32>
    %141 = arith.subf %137, %140 : vector<8x8xf32>
    %142 = math.exp %141 : vector<8x8xf32>
    %cst_44 = arith.constant dense<0.000000e+00> : vector<8xf32>
    %143 = vector.multi_reduction <add>, %142, %cst_44 [1] : vector<8x8xf32> to vector<8xf32>
    %144 = vector.shape_cast %143 : vector<8xf32> to vector<8x1xf32>
    %145 = tpu.reciprocal %144 {approx = true} : vector<8x1xf32> -> vector<8x1xf32>
    %146 = vector.broadcast %145 : vector<8x1xf32> to vector<8x8xf32>
    %147 = arith.mulf %142, %146 : vector<8x8xf32>
    %148 = arith.truncf %147 : vector<8x8xf32> to vector<8x8xbf16>
    %cst_45 = arith.constant dense<0.000000e+00> : vector<8x4xf32>
    %149 = tpu.matmul %148, %136, %cst_45 {dimension_numbers = #tpu.dot_dimension_numbers<[1], [0], [0], [1], [0, 0, 1, 1], [], []>} : vector<8x8xbf16>, vector<8x4xbf16>, vector<8x4xf32> -> vector<8x4xf32>
    %150 = arith.truncf %149 : vector<8x4xf32> to vector<8x4xbf16>
    %c0_46 = arith.constant 0 : index
    %c28 = arith.constant 28 : index
    %151 = vector.load %arg7[%c0_46, %c28] : memref<8x32xbf16, #tpu.memory_space<vmem>>, vector<8x4xbf16>
    tpu.vector_store %arg7[%c0_46, %c28], %150 {strides = array<i32>} : memref<8x32xbf16, #tpu.memory_space<vmem>>, vector<8x4xbf16>,
    %c0_47 = arith.constant 0 : index
    %c0_48 = arith.constant 0 : index
    %152 = vector.load %arg7[%c0_47, %c0_48] : memref<8x32xbf16, #tpu.memory_space<vmem>>, vector<8x32xbf16>
    %c0_49 = arith.constant 0 : index
    %c0_50 = arith.constant 0 : index
    %153 = vector.load %arg4[%c0_49, %c0_50] : memref<32x32xbf16, #tpu.memory_space<vmem>>, vector<32x32xbf16>
    %cst_51 = arith.constant dense<0.000000e+00> : vector<8x32xf32>
    %154 = tpu.matmul %152, %153, %cst_51 {dimension_numbers = #tpu.dot_dimension_numbers<[1], [0], [0], [1], [0, 0, 1, 1], [], []>} : vector<8x32xbf16>, vector<32x32xbf16>, vector<8x32xf32> -> vector<8x32xf32>
    %c0_52 = arith.constant 0 : index
    %c0_53 = arith.constant 0 : index
    %155 = vector.load %arg5[%c0_52, %c0_53] : memref<1x32xf32, #tpu.memory_space<vmem>>, vector<1x32xf32>
    %156 = vector.broadcast %155 : vector<1x32xf32> to vector<8x32xf32>
    %157 = arith.addf %154, %156 : vector<8x32xf32>
    %c0_54 = arith.constant 0 : index
    %c0_55 = arith.constant 0 : index
    %c0_56 = arith.constant 0 : index
    %158 = vector.load %arg6[%c0_54, %c0_55, %c0_56] : memref<1x8x32xf32, #tpu.memory_space<vmem>>, vector<1x8x32xf32>
    %159 = vector.shape_cast %158 : vector<1x8x32xf32> to vector<8x32xf32>
    %160 = vector.shape_cast %157 : vector<8x32xf32> to vector<1x8x32xf32>
    tpu.vector_store %arg6[%c0_54, %c0_55, %c0_56], %160 {strides = array<i32>} : memref<1x8x32xf32, #tpu.memory_space<vmem>>, vector<1x8x32xf32>,
    return
  }
  func.func @transform_0(%arg0: i32) -> (i32, i32, i32) {
    %c0_i32 = arith.constant 0 : i32
    %c0_i32_0 = arith.constant 0 : i32
    %c0_i32_1 = arith.constant 0 : i32
    return %arg0, %c0_i32, %c0_i32_0 : i32, i32, i32
  }
  func.func @transform_1(%arg0: i32) -> (i32, i32) {
    %c0_i32 = arith.constant 0 : i32
    %c0_i32_0 = arith.constant 0 : i32
    %c0_i32_1 = arith.constant 0 : i32
    return %c0_i32, %c0_i32_0 : i32, i32
  }
  func.func @transform_2(%arg0: i32) -> (i32, i32) {
    %c0_i32 = arith.constant 0 : i32
    %c0_i32_0 = arith.constant 0 : i32
    %c0_i32_1 = arith.constant 0 : i32
    return %c0_i32, %c0_i32_0 : i32, i32
  }
  func.func @transform_3(%arg0: i32) -> (i32, i32) {
    %c0_i32 = arith.constant 0 : i32
    %c0_i32_0 = arith.constant 0 : i32
    %c0_i32_1 = arith.constant 0 : i32
    return %c0_i32, %c0_i32_0 : i32, i32
  }
  func.func @transform_4(%arg0: i32) -> (i32, i32) {
    %c0_i32 = arith.constant 0 : i32
    %c0_i32_0 = arith.constant 0 : i32
    %c0_i32_1 = arith.constant 0 : i32
    return %c0_i32, %c0_i32_0 : i32, i32
  }
  func.func @transform_5(%arg0: i32) -> (i32, i32, i32) {
    %c0_i32 = arith.constant 0 : i32
    %c0_i32_0 = arith.constant 0 : i32
    %c0_i32_1 = arith.constant 0 : i32
    return %arg0, %c0_i32, %c0_i32_0 : i32, i32, i32
  }
}

</mosaic_0001>

<bundles_post_ra>
// kernel: tpu_custom_call.1
= control target key start
LH: loop header
LB: loop body
LE: loop exit
PB: predicated region body
PF: predicated region fallthrough
CT: control target
= control target key end

     0   :  { %10 = vsyncpa [#allocation4], 0  ;;  %s1631_s0 = inlined_call_operand.hbm [shape: bf16[2,8,32], index: 0, kind: input, shape index: {}]   ;;  %s1632_s1 = inlined_call_operand.hbm [shape: bf16[32,96], index: 1, kind: input, shape index: {}]   ;;  %s1633_s2 = inlined_call_operand.vmem [shape: f32[1,96], index: 2, kind: input, shape index: {}]   ;;  %s1634_s3 = inlined_call_operand.hbm [shape: bf16[32,32], index: 3, kind: input, shape index: {}]   ;;  %s1635_s4 = inlined_call_operand.vmem [shape: f32[1,32], index: 4, kind: input, shape index: {}]   ;;  %s1636_s5 = inlined_call_operand.hbm [shape: f32[2,8,32], index: 5, kind: output, shape index: {}]  }
   0x1   :  { %12 = vsyncpa [#allocation4 + $0x1], 0 }
   0x2   :  { %13 = vsyncpa [#allocation7], 0 }
   0x3   :  { %14 = vsyncpa [#allocation5], 0 }
   0x4   :  { %16 = vsyncpa [#allocation5 + $0x1], 0  ;;  %s1375_s18 = smov 0   ;;  %s1377_s19 = smov 0  }
   0x5   :  { %s1379_s20 = smov 0   ;;  %s1381_s21 = smov 0  }
   0x6 LB: > { %s174_s24 = sshll.u32 %s1632_s1, 4  ;;  %s1399_s25 = sadd.s32 4294967295, %s1309_s21   ;;  %s1309_s21 = sphi %s1381_s21, %s1647_s21   ;;  %s1305_s20 = sphi %s1379_s20, %s1646_s20   ;;  %s1301_s19 = sphi %s1377_s19, %s1645_s19   ;;  %s1297_s18 = sphi %s1375_s18, %s1644_s18   ;;  %s175_s24 = int_to_ptr.hbm [resolvable:$true] %s174_s24 }
   0x7   : > { %p963_p0 = scmp.ge.s32.totalorder %s1309_s21, 1  ;;  %p43_p1 = scmp.eq.s32.totalorder %s1399_s25, 0 }
   0x8   : > { %p163_p2 = scmp.lt.s32.totalorder %s1309_s21, 3  ;;  %s1311_s27 = smov [#allocation6]  }
   0x9   : > { %s176_s28 = sshll.u32 %s1311_s27, 4  ;;  %s191_s6 = sshll.u32 %s1634_s3, 4  ;;  %s177_s28 = int_to_ptr.vmem [resolvable:$true] %s176_s28  ;;  %s192_s6 = int_to_ptr.hbm [resolvable:$true] %s191_s6 }
   0xa   : > { %p1404_p3 = pnand %p963_p0, %p163_p2  ;;  %s1312_s7 = smov [#allocation8]  }
   0xb   : > { %s193_s8 = sshll.u32 %s1312_s7, 4  ;;  %s1313_s9 = smov 64   ;;  %s194_s8 = int_to_ptr.vmem [resolvable:$true] %s193_s8 }
   0xc   : > { %p1028_p4 = pneg %p1404_p3  ;;  %s1314_s10 = smov 4  }
   0xd   : > { %s962_s11 = sadd.s32 4294967294, %s1309_s21   ;;  %s1418_s12 = sadd.s32 1, %s1309_s21  }
   0xe   : > { %p1029_p6 = pnand %p1028_p4, %p43_p1  ;;  %s26_s13 = ssub.s32 %s1309_s21, %s1418_s12 }
   0xf   : > { %s29_s14 = sadd.s32 1, %s1305_s20  ;;  %p27_p7 = scmp.eq.s32.totalorder %s26_s13, 0 }
  0x10   : > { %1031 = dma.hbm_to_vmem [thread:$0]  (!%p1029_p6), %s175_s24, 256, %s177_s28, [#allocation7], %s1313_s9, %s1313_s9, %s1314_s10  }
  0x11   : > { %1034 = dma.hbm_to_vmem [thread:$0]  (!%p1029_p6), %s192_s6, 256, %s194_s8, [#allocation7], %s1313_s9, %s1313_s9, %s1314_s10  }
  0x12   : > { %p36_p8 = scmp.ne.s32.totalorder %s1305_s20, %s1301_s19  ;;  %p37_p9 = scmp.eq.s32.totalorder %s1309_s21, 0 }
  0x13   : > { %p42_p10 = scmp.ne.s32.totalorder %s1301_s19, %s1297_s18  ;;  %p150_p13 = scmp.eq.s32.totalorder %s1399_s25, 1 }
  0x14   : > { %s1429_s15 = scalar_select %p27_p7, %s1305_s20, %s29_s14  }
  0x15   : > { %p1431_p11 = por %p37_p9, %p36_p8  ;;  %p1437_p12 = por %p43_p1, %p42_p10 }
  0x16   : > { %p156_p0 = scmp.eq.s32.totalorder %s962_s11, 1  ;;  %p1045_p2 = scmp.lt.s32.totalorder %s1309_s21, 2 }
  0x17   : > { %s210_s22 = sand.u32 1, %s1305_s20   ;;  %p1444_p4 = por %p150_p13, %p36_p8 }
  0x18   : > { %p1448_p6 = por %p156_p0, %p42_p10  ;;  %s967_s27 = sshll.u32 %s210_s22, 2 }
  0x19   : > { %s968_s28 = sshll.u32 %s1309_s21, 2  ;;  %s214_s7 = scalar_lea.vmem [#allocation3], %s967_s27 }
  0x1a   : > { %s218_s6 = scalar_lea.hbm %s1631_s0, %s968_s28  ;;  %s222_s8 = sshll.u32 %s214_s7, 4  ;;  %s223_s8 = int_to_ptr.vmem [resolvable:$true] %s222_s8 }
  0x1b   : > { %s220_s9 = sshll.u32 %s218_s6, 4  ;;  %p1458_p7 = pnand %p1045_p2, %p1431_p11  ;;  %s221_s9 = int_to_ptr.hbm [resolvable:$true] %s220_s9 }
  0x1c   : > { %s211_s11 = scalar_lea.sflag [#allocation4], %s210_s22  ;;  %s1209_s13 = sshra.s32 %s221_s9, 4  ;;  %s1210_s13 = int_to_ptr.hbm [resolvable:$true] %s1209_s13 }
  0x1d   : > { %s1211_s14 = scalar_lea.hbm %s1210_s13, 4  ;;  %p1213_p9 = pneg %p1458_p7 }
  0x1e   : > { %p1212_p8 = scmp.ne.s32.totalorder %s1210_s13, %s1211_s14  ;;  %s1216_s29 = scalar_lea.hbm %s1631_s0, 8 }
  0x1f   : > { %p1217_p11 = scmp.lt.s32.totalorder %s1210_s13, %s1631_s0  ;;  %p1218_p0 = scmp.lt.s32.totalorder %s1216_s29, %s1211_s14 }
  0x20   : > { %p1214_p10 = pnand %p1213_p9, %p1212_p8 }
  0x21   : > { %p1219_p2 = por %p1218_p0, %p1217_p11 }
  0x22   : > { %p1215_p13 = pneg %p1214_p10 }
  0x24   : > { %p1220_p5 = pnand %p1219_p2, %p1215_p13 }
  0x26   : > { %1223 = shalt.err (!%p1220_p5)
}
  0x27   : > { %1038 = dma.hbm_to_vmem [thread:$0]  (!%p1458_p7), %s221_s9, 64, %s223_s8, %s211_s11  }
  0x28   : > { %231 = sbr.rel (%p1404_p3) target bundleno = 1180 (0x49c), region = 40  ;;  %s1475_s22 = sand.u32 (!%p1404_p3), 1, %s1301_s19  }
  0x29   : > { %s970_s6 = sshll.u32 (!%p1404_p3), %s1475_s22, 2  ;;  %s234_s7 = scalar_lea.sflag (!%p1404_p3), [#allocation4], %s1475_s22 }
  0x2a   : > { %s237_s27 = scalar_lea.vmem (!%p1404_p3), [#allocation3], %s970_s6 }
  0x2d   : > { %1284 = dma.done.wait (%p1437_p12), %s234_s7, 64  }
  0x2e   : > { %1286 = vsyncadd (%p1437_p12), %s234_s7, 4294967232 }
  0x2f   : > { %1288 = dma.done.wait (%p43_p1), [#allocation7], 512  }
  0x30   : > { %1290 = vsyncadd (%p43_p1), [#allocation7], 4294966784  ;;  %v1013_v0 = vld [vmem:[#allocation6 + $0x8] sm:$0xff]  ;;  %v1012_v1 = vld [vmem:[#allocation6] sm:$0xff]  ;;  %vm297_vm0 = vcmask 261120   ;;  %s1315_s17 = smov 116  }
  0x31   : > { %307 = vmatpush.bf16.msra.mxu0 %v1013_v0  ;;  %v276_v2 = vld [vmem:[%s237_s27] sm:$0xf]  ;;  %v1115_v3 = vld [vmem:[%s1633_s2] ss:$0 sm:$0xff]  ;;  %s1316_s9 = smov 124   ;;  %s1317_s10 = smov 96  }
  0x32   : > { %s1318_s11 = smov 88   ;;  %s1319_s13 = smov 84   ;;  %vm320_vm1 = vcmask 31744   ;;  %vm340_vm2 = vcmask 64512   ;;  %vm358_vm3 = vcmask 1043456   ;;  %vm376_vm4 = vcmask 27648  }
  0x33   : > { %s1320_s14 = smov 92   ;;  %s1321_s28 = smov 108   ;;  %vm439_vm5 = vcmask 60448   ;;  %vm502_vm6 = vcmask 93248   ;;  %vm565_vm7 = vcmask 126048   ;;  %vm628_vm8 = vcmask 158848  }
  0x34   : > { %s1322_s29 = smov 120   ;;  %s1323_s30 = smov 76   ;;  %vm691_vm9 = vcmask 191648   ;;  %vm754_vm10 = vcmask 224448   ;;  %vm817_vm11 = vcmask 257248  }
  0x35   : > { %308 = vmatpush.bf16.msra.mxu0 %v1012_v1  ;;  %s1324_s16 = smov 112   ;;  %s1325_s6 = smov 68  }
  0x36   : > { %s1326_s7 = smov 80   ;;  %s1327_s27 = smov 104  }
  0x37   : > { %s1328_s26 = smov 72   ;;  %s1329_s8 = smov 100  }
  0x38   : > { %982 = vmatmul.msk.bf16.vlgmr.msra.gmra.mxu0 %vm297_vm0, %v276_v2 }
  0xb5   : > { %v310_v4 = vpop.f32.mrf.mxu0 }
  0xb6   : > { %v311_v5 = vadd.f32 %v1115_v3, %v310_v4 }
  0xb8   : > { %v314_v6 = vpack.c.bf16 %v311_v5, %v311_v5 }
  0xba   : > { %v316_v7 = vunpack.c.l.b16 %v314_v6 }
  0xbc   : > { %v1491_v8 = vpack.c.b16 %v316_v7, %v316_v7 }
  0xbd   : > { %v312_v9 = vpop.f32.mrf.mxu0 }
  0xbe   : > { %504 = vrot.lane.b32.xlu2 %v1491_v8, %s1315_s17  ;;  %378 = vrot.lane.b32.xlu1 %v1491_v8, %s1316_s9  ;;  %s1330_s17 = smov 60   ;;  %s1331_s9 = smov 64  }
  0xbf   : > { %318 = vrot.lane.b32.xlu0 %v1491_v8, %s1317_s10  ;;  %s1332_s10 = smov 52  }
  0xc6   : > { %443 = vrot.lane.b32.xlu2 %v1491_v8, %s1318_s11  ;;  %506 = vrot.lane.b32.xlu1 %v1491_v8, %s1319_s13  ;;  %s1333_s11 = smov 44   ;;  %s1334_s13 = smov 48  }
  0xc7   : > { %380 = vrot.lane.b32.xlu0 %v1491_v8, %s1320_s14  ;;  %s1335_s14 = smov 56  }
  0xce   : > { %630 = vrot.lane.b32.xlu2 %v1491_v8, %s1321_s28  ;;  %441 = vrot.lane.b32.xlu1 %v1491_v8, %s1322_s29  ;;  %s1336_s28 = smov 36   ;;  %s1337_s29 = smov 40  }
  0xcf   : > { %632 = vrot.lane.b32.xlu0 %v1491_v8, %s1323_s30  ;;  %s1338_s30 = smov 8  }
  0xd6   : > { %567 = vrot.lane.b32.xlu2 %v1491_v8, %s1324_s16  ;;  %758 = vrot.lane.b32.xlu1 %v1491_v8, %s1325_s6  ;;  %s1339_s16 = smov 4   ;;  %s1340_s6 = smov 16  }
  0xd7   : > { %569 = vrot.lane.b32.xlu0 %v1491_v8, %s1326_s7  ;;  %s1341_s7 = smov 12  }
  0xde   : > { %693 = vrot.lane.b32.xlu2 %v1491_v8, %s1327_s27  ;;  %695 = vrot.lane.b32.xlu1 %v1491_v8, %s1328_s26  ;;  %s1342_s27 = smov 24   ;;  %s1343_s26 = smov 20  }
  0xdf   : > { %756 = vrot.lane.b32.xlu0 %v1491_v8, %s1329_s8  ;;  %s1344_s8 = smov 28  }
  0xe6   : > { %413 = vrot.lane.b32.xlu2 %v1491_v8, %s1330_s17  ;;  %s1009_s17 = sshll.u32 %s1399_s25, 3  ;;  %s858_s25 = scalar_lea.sflag [#allocation5], %s1475_s22 }
 0x118   : > { %v505_v10 = vpop.permute.xlu2 %504 }
 0x120   : > { %v444_v11 = vpop.permute.xlu2 %443 }
 0x121   : > { %v449_v12 = vsel %vm320_vm1, %v444_v11, 0 }
 0x122   : > { %458 = vmatpush.bf16.xpose.msrb.mxu0 %v449_v12 }
 0x128   : > { %v631_v23 = vpop.permute.xlu2 %630 }
 0x130   : > { %v379_v13 = vpop.permute.xlu1 %378  ;;  %v568_v28 = vpop.permute.xlu2 %567 }
 0x131   : > { %v319_v14 = vpop.permute.xlu0 %318 }
 0x132   : > { %v325_v15 = vsel %vm320_vm1, %v319_v14, 0 }
 0x133   : > { %334 = vmatpush.bf16.xpose.msra.mxu1 %v325_v15 }
 0x138   : > { %v507_v16 = vpop.permute.xlu1 %506  ;;  %v694_v31 = vpop.permute.xlu2 %693 }
 0x139   : > { %v381_v17 = vpop.permute.xlu0 %380  ;;  %v512_v18 = vsel %vm320_vm1, %v507_v16, 0 }
 0x13a   : > { %983 = vmatmul.msk.bf16.vlgmr.msra.gmra.mxu1 %vm320_vm1, %v314_v6  ;;  %v386_v19 = vsel %vm320_vm1, %v381_v17, 0 }
 0x13b   : > { %395 = vmatpush.bf16.xpose.msra.mxu3 %v386_v19 }
 0x140   : > { %v442_v20 = vpop.permute.xlu1 %441  ;;  %v414_v57 = vpop.permute.xlu2 %413 }
 0x141   : > { %v633_v21 = vpop.permute.xlu0 %632  ;;  %987 = vmatmul.msk.bf16.vlgmr.msrb.gmra.mxu0 %vm320_vm1, %v442_v20 }
 0x142   : > { %v638_v22 = vsel %vm320_vm1, %v633_v21, 0  ;;  %985 = vmatmul.msk.bf16.vlgmr.msra.gmra.mxu3 %vm320_vm1, %v379_v13 }
 0x143   : > { %521 = vmatpush.bf16.xpose.msrb.mxu3 %v512_v18 }
 0x148   : > { %v759_v24 = vpop.permute.xlu1 %758 }
 0x149   : > { %v570_v25 = vpop.permute.xlu0 %569  ;;  %v764_v30 = vsel %vm320_vm1, %v759_v24, 0 }
 0x14a   : > { %v575_v26 = vsel %vm320_vm1, %v570_v25, 0 }
 0x14b   : > { %647 = vmatpush.bf16.xpose.msra.mxu3 %v638_v22  ;;  %584 = vmatpush.bf16.xpose.msra.mxu0 %v575_v26 }
 0x150   : > { %v696_v27 = vpop.permute.xlu1 %695 }
 0x151   : > { %v701_v29 = vsel %vm320_vm1, %v696_v27, 0  ;;  %v757_v32 = vpop.permute.xlu0 %756 }
 0x152   : > { %989 = vmatmul.msk.bf16.vlgmr.msrb.gmra.mxu3 %vm320_vm1, %v505_v10  ;;  %991 = vmatmul.msk.bf16.vlgmr.msra.gmra.mxu0 %vm320_vm1, %v568_v28  ;;  %v419_v10 = vsel %vm358_vm3, %v414_v57, 0 }
 0x153   : > { %773 = vmatpush.bf16.xpose.msrb.mxu3 %v764_v30  ;;  %710 = vmatpush.bf16.xpose.msrb.mxu0 %v701_v29 }
 0x162   : > { %993 = vmatmul.msk.bf16.vlgmr.msra.gmra.mxu3 %vm320_vm1, %v631_v23  ;;  %995 = vmatmul.msk.bf16.vlgmr.msrb.gmra.mxu0 %vm320_vm1, %v694_v31 }
 0x172   : > { %997 = vmatmul.msk.bf16.vlgmr.msrb.gmra.mxu3 %vm320_vm1, %v757_v32 }
 0x1b7   : > { %v336_v33 = vpop.f32.mrf.mxu1 }
 0x1b8   : > { %v341_v34 = vsel %vm340_vm2, %v336_v33, -inf }
 0x1b9   : > { %342 = vmax.xlane.f32.xlu0 %v341_v34 }
 0x1be   : > { %v460_v35 = vpop.f32.mrf.mxu0 }
 0x1bf   : > { %v338_v36 = vpop.f32.mrf.mxu1  ;;  %v464_v37 = vsel %vm340_vm2, %v460_v35, -inf }
 0x1c0   : > { %465 = vmax.xlane.f32.xlu2 %v464_v37 }
 0x1c5   : > { %v397_v38 = vpop.f32.mrf.mxu3 }
 0x1c6   : > { %v462_v39 = vpop.f32.mrf.mxu0  ;;  %v401_v40 = vsel %vm340_vm2, %v397_v38, -inf }
 0x1c7   : > { %402 = vmax.xlane.f32.xlu1 %v401_v40 }
 0x1cd   : > { %353 = vrot.lane.b32.xlu0 %v1491_v8, %s1331_s9  ;;  %v399_v41 = vpop.f32.mrf.mxu3  ;;  %s973_s9 = sshll.u32 %s1475_s22, 3 }
 0x1cf   : > { %v586_v42 = vpop.f32.mrf.mxu0 }
 0x1d0   : > { %v590_v43 = vsel %vm340_vm2, %v586_v42, -inf }
 0x1d1   : > { %591 = vmax.xlane.f32.xlu2 %v590_v43 }
 0x1d5   : > { %v523_v44 = vpop.f32.mrf.mxu3 }
 0x1d6   : > { %v527_v46 = vsel %vm340_vm2, %v523_v44, -inf }
 0x1d7   : > { %v588_v45 = vpop.f32.mrf.mxu0 }
 0x1d9   : > { %528 = vmax.xlane.f32.xlu2 %v527_v46 }
 0x1dd   : > { %v525_v47 = vpop.f32.mrf.mxu3 }
 0x1df   : > { %v712_v48 = vpop.f32.mrf.mxu0 }
 0x1e0   : > { %v716_v49 = vsel %vm340_vm2, %v712_v48, -inf }
 0x1e1   : > { %717 = vmax.xlane.f32.xlu1 %v716_v49 }
 0x1e5   : > { %v649_v50 = vpop.f32.mrf.mxu3 }
 0x1e6   : > { %v653_v54 = vsel %vm340_vm2, %v649_v50, -inf }
 0x1e7   : > { %v714_v51 = vpop.f32.mrf.mxu0 }
 0x1ed   : > { %v651_v52 = vpop.f32.mrf.mxu3 }
 0x1f5   : > { %v1532_v53 = vpop.f32.mrf.mxu3 }
 0x1f6   : > { %v779_v55 = vsel %vm340_vm2, %v1532_v53, -inf }
 0x1f7   : > { %654 = vmax.xlane.f32.xlu0 %v653_v54  ;;  %780 = vmax.xlane.f32.xlu1 %v779_v55 }
 0x1fd   : > { %v777_v56 = vpop.f32.mrf.mxu3 }
 0x22c   : > { %v343_v58 = vpop.xlane.xlu0 %342 }
 0x22d   : > { %v344_v59 = vsub.f32 %v336_v33, %v343_v58 }
 0x22f   : > { %v345_v60 = vmul.f32 1.442695, %v344_v59 }
 0x231   : > { %1117 = vpow2.f32 %v345_v60 }
 0x233   : > { %v466_v61 = vpop.xlane.xlu2 %465 }
 0x234   : > { %v467_v62 = vsub.f32 %v460_v35, %v466_v61 }
 0x236   : > { %v468_v63 = vmul.f32 1.442695, %v467_v62 }
 0x237   : > { %v1537_v0 = vpop.eup %1117 }
 0x238   : > { %1119 = vpow2.f32 %v468_v63  ;;  %v347_v1 = vsel %vm340_vm2, %v1537_v0, 0.0 }
 0x239   : > { %348 = vadd.xlane.f32.xlu1 %v347_v1 }
 0x23a   : > { %v403_v2 = vpop.xlane.xlu1 %402 }
 0x23b   : > { %v404_v3 = vsub.f32 %v397_v38, %v403_v2 }
 0x23d   : > { %v405_v4 = vmul.f32 1.442695, %v404_v3 }
 0x23e   : > { %v1541_v5 = vpop.eup %1119 }
 0x23f   : > { %1121 = vpow2.f32 %v405_v4  ;;  %v354_v6 = vpop.permute.xlu0 %353  ;;  %v470_v7 = vsel %vm340_vm2, %v1541_v5, 0.0 }
 0x240   : > { %471 = vadd.xlane.f32.xlu0 %v470_v7  ;;  %v360_v9 = vsel %vm358_vm3, %v354_v6, 0 }
 0x241   : > { %369 = vmatpush.bf16.msra.mxu2 %v360_v9 }
 0x244   : > { %v592_v13 = vpop.xlane.xlu2 %591 }
 0x245   : > { %428 = vmatpush.bf16.msrb.mxu2 %v419_v10  ;;  %v1547_v11 = vpop.eup %1121  ;;  %v593_v14 = vsub.f32 %v586_v42, %v592_v13 }
 0x246   : > { %v407_v12 = vsel %vm340_vm2, %v1547_v11, 0.0 }
 0x247   : > { %408 = vadd.xlane.f32.xlu2 %v407_v12  ;;  %v594_v15 = vmul.f32 1.442695, %v593_v14 }
 0x249   : > { %1123 = vpow2.f32 %v594_v15 }
 0x24c   : > { %v529_v16 = vpop.xlane.xlu2 %528 }
 0x24d   : > { %v530_v18 = vsub.f32 %v523_v44, %v529_v16 }
 0x24f   : > { %v531_v21 = vmul.f32 1.442695, %v530_v18  ;;  %v1124_v23 = vpop.eup %1123 }
 0x250   : > { %v596_v27 = vsel %vm340_vm2, %v1124_v23, 0.0 }
 0x251   : > { %1125 = vpow2.f32 %v531_v21 }
 0x252   : > { %539 = vrot.lane.b32.xlu1 %v1491_v8, %s1332_s10 }
 0x254   : > { %665 = vrot.lane.b32.xlu0 %v1491_v8, %s1333_s11  ;;  %v718_v17 = vpop.xlane.xlu1 %717 }
 0x255   : > { %v719_v20 = vsub.f32 %v712_v48, %v718_v17 }
 0x257   : > { %v720_v24 = vmul.f32 1.442695, %v719_v20  ;;  %v1126_v29 = vpop.eup %1125 }
 0x258   : > { %v533_v32 = vsel %vm340_vm2, %v1126_v29, 0.0 }
 0x259   : > { %1127 = vpow2.f32 %v720_v24 }
 0x25c   : > { %602 = vrot.lane.b32.xlu0 %v1491_v8, %s1334_s13  ;;  %s868_s13 = scalar_lea.hbm %s1636_s5, %s1009_s17 }
 0x25f   : > { %476 = vrot.lane.b32.xlu2 %v1491_v8, %s1335_s14  ;;  %v1557_v30 = vpop.eup %1127 }
 0x260   : > { %v722_v34 = vsel %vm340_vm2, %v1557_v30, 0.0 }
 0x26a   : > { %v655_v19 = vpop.xlane.xlu0 %654  ;;  %v781_v26 = vpop.xlane.xlu1 %780 }
 0x26b   : > { %v656_v22 = vsub.f32 %v649_v50, %v655_v19  ;;  %v782_v28 = vsub.f32 %v1532_v53, %v781_v26 }
 0x26d   : > { %v657_v25 = vmul.f32 1.442695, %v656_v22  ;;  %v783_v31 = vmul.f32 1.442695, %v782_v28 }
 0x26f   : > { %1129 = vpow2.f32 %v657_v25 }
 0x270   : > { %1131 = vpow2.f32 %v783_v31 }
 0x275   : > { %v1560_v33 = vpop.eup %1129 }
 0x276   : > { %v659_v35 = vsel %vm340_vm2, %v1560_v33, 0.0  ;;  %v1566_v36 = vpop.eup %1131 }
 0x277   : > { %v785_v37 = vsel %vm340_vm2, %v1566_v36, 0.0 }
 0x27c   : > { %597 = vadd.xlane.f32.xlu1 %v596_v27 }
 0x284   : > { %534 = vadd.xlane.f32.xlu1 %v533_v32 }
 0x286   : > { %723 = vadd.xlane.f32.xlu0 %v722_v34 }
 0x288   : > { %660 = vadd.xlane.f32.xlu2 %v659_v35 }
 0x290   : > { %786 = vadd.xlane.f32.xlu2 %v785_v37 }
 0x29d   : > { %791 = vrot.lane.b32.xlu1 %v1491_v8, %s1336_s28 }
 0x2a8   : > { %728 = vrot.lane.b32.xlu2 %v1491_v8, %s1337_s29  ;;  %s274_s29 = scalar_lea.vmem [#allocation9], %s973_s9 }
 0x2ac   : > { %v349_v38 = vpop.xlane.xlu1 %348 }
 0x2ad   : > { %1133 = vrcp.f32 %v349_v38 }
 0x2b3   : > { %v1134_v39 = vpop.eup %1133  ;;  %v472_v41 = vpop.xlane.xlu0 %471 }
 0x2b4   : > { %v351_v40 = vmul.f32 %v1134_v39, %v1537_v0  ;;  %1135 = vrcp.f32 %v472_v41 }
 0x2b6   : > { %v352_v42 = vpack.c.bf16 %v351_v40, %v351_v40 }
 0x2b8   : > { %984 = vmatmul.msk.bf16.vlgmr.msra.gmra.mxu2 %vm340_vm2, %v352_v42 }
 0x2ba   : > { %v409_v43 = vpop.xlane.xlu2 %408  ;;  %v1136_v44 = vpop.eup %1135 }
 0x2bb   : > { %1137 = vrcp.f32 %v409_v43  ;;  %v474_v46 = vmul.f32 %v1136_v44, %v1541_v5  ;;  %v1015_v44 = vld [vmem:[#allocation8 + $0x8] sm:$0xff] }
 0x2bc   : > { %849 = vmatpush.bf16.msra.mxu0 %v1015_v44 }
 0x2bd   : > { %v475_v51 = vpack.c.bf16 %v474_v46, %v474_v46 }
 0x2c1   : > { %v1138_v45 = vpop.eup %1137 }
 0x2c2   : > { %v411_v47 = vmul.f32 %v1138_v45, %v1547_v11  ;;  %v477_v48 = vpop.permute.xlu2 %476  ;;  %v1014_v45 = vld [vmem:[#allocation8] sm:$0xff] }
 0x2c3   : > { %v482_v8 = vsel %vm358_vm3, %v477_v48, 0  ;;  %850 = vmatpush.bf16.msra.mxu0 %v1014_v45 }
 0x2c4   : > { %491 = vmatpush.bf16.msrb.mxu1 %v482_v8  ;;  %v540_v49 = vpop.permute.xlu1 %539  ;;  %v412_v53 = vpack.c.bf16 %v411_v47, %v411_v47 }
 0x2c5   : > { %v545_v50 = vsel %vm358_vm3, %v540_v49, 0 }
 0x2c6   : > { %554 = vmatpush.bf16.msra.mxu2 %v545_v50  ;;  %v666_v52 = vpop.permute.xlu0 %665 }
 0x2c7   : > { %988 = vmatmul.msk.bf16.vlgmr.msrb.gmra.mxu1 %vm340_vm2, %v475_v51  ;;  %v671_v54 = vsel %vm358_vm3, %v666_v52, 0  ;;  %v1116_v51 = vld [vmem:[%s1635_s4] ss:$0 sm:$0xff] }
 0x2c8   : > { %986 = vmatmul.msk.bf16.vlgmr.msrb.gmra.mxu2 %vm340_vm2, %v412_v53 }
 0x2ca   : > { %680 = vmatpush.bf16.msrb.mxu2 %v671_v54 }
 0x2ce   : > { %v603_v55 = vpop.permute.xlu0 %602 }
 0x2cf   : > { %v608_v56 = vsel %vm358_vm3, %v603_v55, 0 }
 0x2d0   : > { %617 = vmatpush.bf16.msra.mxu1 %v608_v56 }
 0x2ef   : > { %v598_v57 = vpop.xlane.xlu1 %597 }
 0x2f0   : > { %1139 = vrcp.f32 %v598_v57 }
 0x2f6   : > { %v1140_v58 = vpop.eup %1139 }
 0x2f7   : > { %v600_v59 = vmul.f32 %v1140_v58, %v1124_v23  ;;  %v535_v60 = vpop.xlane.xlu1 %534 }
 0x2f8   : > { %1141 = vrcp.f32 %v535_v60 }
 0x2f9   : > { %v601_v61 = vpack.c.bf16 %v600_v59, %v600_v59  ;;  %v724_v0 = vpop.xlane.xlu0 %723 }
 0x2fa   : > { %1143 = vrcp.f32 %v724_v0 }
 0x2fb   : > { %v661_v62 = vpop.xlane.xlu2 %660  ;;  %992 = vmatmul.msk.bf16.vlgmr.msra.gmra.mxu1 %vm340_vm2, %v601_v61 }
 0x2fc   : > { %1145 = vrcp.f32 %v661_v62 }
 0x2fe   : > { %v1142_v63 = vpop.eup %1141 }
 0x2ff   : > { %v537_v1 = vmul.f32 %v1142_v63, %v1126_v29 }
 0x300   : > { %v1144_v4 = vpop.eup %1143 }
 0x301   : > { %v538_v2 = vpack.c.bf16 %v537_v1, %v537_v1  ;;  %v726_v6 = vmul.f32 %v1144_v4, %v1557_v30 }
 0x302   : > { %v1146_v5 = vpop.eup %1145 }
 0x303   : > { %990 = vmatmul.msk.bf16.vlgmr.msra.gmra.mxu2 %vm340_vm2, %v538_v2  ;;  %v787_v3 = vpop.xlane.xlu2 %786  ;;  %v663_v10 = vmul.f32 %v1146_v5, %v1560_v33  ;;  %v727_v11 = vpack.c.bf16 %v726_v6, %v726_v6 }
 0x304   : > { %1147 = vrcp.f32 %v787_v3 }
 0x305   : > { %v664_v14 = vpack.c.bf16 %v663_v10, %v663_v10 }
 0x30a   : > { %v1148_v15 = vpop.eup %1147 }
 0x30b   : > { %v729_v7 = vpop.permute.xlu2 %728  ;;  %v789_v16 = vmul.f32 %v1148_v15, %v1566_v36 }
 0x30c   : > { %v734_v9 = vsel %vm358_vm3, %v729_v7, 0 }
 0x30d   : > { %743 = vmatpush.bf16.msrb.mxu1 %v734_v9  ;;  %v790_v17 = vpack.c.bf16 %v789_v16, %v789_v16 }
 0x30f   : > { %v792_v12 = vpop.permute.xlu1 %791 }
 0x310   : > { %v797_v13 = vsel %vm358_vm3, %v792_v12, 0  ;;  %996 = vmatmul.msk.bf16.vlgmr.msrb.gmra.mxu1 %vm340_vm2, %v727_v11 }
 0x311   : > { %806 = vmatpush.bf16.msra.mxu2 %v797_v13 }
 0x313   : > { %994 = vmatmul.msk.bf16.vlgmr.msrb.gmra.mxu2 %vm340_vm2, %v664_v14 }
 0x323   : > { %998 = vmatmul.msk.bf16.vlgmr.msra.gmra.mxu2 %vm340_vm2, %v790_v17 }
 0x33b   : > { %v371_v18 = vpop.f32.mrf.mxu2 }
 0x33c   : > { %v375_v19 = vpack.c.bf16 %v371_v18, %v371_v18 }
 0x33e   : > { %377 = vst.msk [vmem:[#allocation2] sm:$0xf] %vm376_vm4, %v375_v19 }
 0x343   : > { %v373_v20 = vpop.f32.mrf.mxu2 }
 0x344   : > { %v493_v21 = vpop.f32.mrf.mxu1 }
 0x345   : > { %v497_v22 = vpack.c.bf16 %v493_v21, %v493_v21 }
 0x347   : > { %499 = vrot.lane.b32.xlu2 %v497_v22, %s1338_s30  ;;  %s870_s30 = sshll.u32 %s274_s29, 4  ;;  %s871_s30 = int_to_ptr.vmem [resolvable:$true] %s870_s30 }
 0x34b   : > { %v430_v23 = vpop.f32.mrf.mxu2 }
 0x34c   : > { %v434_v24 = vpack.c.bf16 %v430_v23, %v430_v23  ;;  %v495_v25 = vpop.f32.mrf.mxu1 }
 0x34e   : > { %436 = vrot.lane.b32.xlu1 %v434_v24, %s1339_s16  ;;  %s872_s16 = sshll.u32 %s868_s13, 4  ;;  %s873_s16 = int_to_ptr.hbm [resolvable:$true] %s872_s16 }
 0x353   : > { %v432_v26 = vpop.f32.mrf.mxu2 }
 0x378   : > { %v619_v27 = vpop.f32.mrf.mxu1 }
 0x379   : > { %v623_v28 = vpack.c.bf16 %v619_v27, %v619_v27 }
 0x37b   : > { %625 = vrot.lane.b32.xlu2 %v623_v28, %s1340_s6  ;;  %s1253_s6 = sshra.s32 %s873_s16, 4  ;;  %s1254_s6 = int_to_ptr.hbm [resolvable:$true] %s1253_s6 }
 0x37c   : > { %p1260_p12 = scmp.lt.s32.totalorder %s1254_s6, %s1636_s5 }
 0x380   : > { %v621_v29 = vpop.f32.mrf.mxu1 }
 0x386   : > { %v556_v30 = vpop.f32.mrf.mxu2 }
 0x387   : > { %v560_v31 = vpack.c.bf16 %v556_v30, %v556_v30 }
 0x389   : > { %562 = vrot.lane.b32.xlu1 %v560_v31, %s1341_s7  ;;  %s1255_s7 = scalar_lea.hbm %s1254_s6, 8 }
 0x38a   : > { %p1256_p1 = scmp.ne.s32.totalorder %s1254_s6, %s1255_s7 }
 0x38c   : > { %p1257_p3 = pnand %p1256_p1, %p1444_p4 }
 0x38d   : > { %v745_v32 = vpop.f32.mrf.mxu1 }
 0x38e   : > { %v749_v33 = vpack.c.bf16 %v745_v32, %v745_v32  ;;  %v558_v34 = vpop.f32.mrf.mxu2  ;;  %p1258_p5 = pneg %p1257_p3 }
 0x391   : > { %751 = vrot.lane.b32.xlu1 %v749_v33, %s1342_s27 }
 0x395   : > { %v747_v35 = vpop.f32.mrf.mxu1 }
 0x396   : > { %v682_v36 = vpop.f32.mrf.mxu2 }
 0x397   : > { %v686_v37 = vpack.c.bf16 %v682_v36, %v682_v36 }
 0x399   : > { %688 = vrot.lane.b32.xlu0 %v686_v37, %s1343_s26 }
 0x39e   : > { %v684_v38 = vpop.f32.mrf.mxu2 }
 0x3a1   : > { %v500_v43 = vpop.permute.xlu2 %499 }
 0x3a6   : > { %v808_v39 = vpop.f32.mrf.mxu2 }
 0x3a7   : > { %v812_v40 = vpack.c.bf16 %v808_v39, %v808_v39 }
 0x3a9   : > { %814 = vrot.lane.b32.xlu2 %v812_v40, %s1344_s8  ;;  %s1259_s8 = scalar_lea.hbm %s1636_s5, 16 }
 0x3aa   : > { %p1261_p7 = scmp.lt.s32.totalorder %s1259_s8, %s1255_s7 }
 0x3ac   : > { %p1262_p8 = por %p1261_p7, %p1260_p12 }
 0x3ae   : > { %v810_v41 = vpop.f32.mrf.mxu2  ;;  %p1263_p9 = pnand %p1262_p8, %p1258_p5 }
 0x3c0   : > { %v437_v42 = vpop.permute.xlu1 %436 }
 0x3c1   : > { %440 = vst.msk [vmem:[#allocation2] sm:$0xf] %vm439_vm5, %v437_v42 }
 0x3c2   : > { %503 = vst.msk [vmem:[#allocation2] sm:$0xf] %vm502_vm6, %v500_v43 }
 0x3d5   : > { %v626_v47 = vpop.permute.xlu2 %625 }
 0x3fb   : > { %v563_v46 = vpop.permute.xlu1 %562 }
 0x3fc   : > { %566 = vst.msk [vmem:[#allocation2] sm:$0xf] %vm565_vm7, %v563_v46 }
 0x3fd   : > { %629 = vst.msk [vmem:[#allocation2] sm:$0xf] %vm628_vm8, %v626_v47 }
 0x403   : > { %v752_v8 = vpop.permute.xlu1 %751  ;;  %v815_v49 = vpop.permute.xlu2 %814 }
 0x40b   : > { %v689_v48 = vpop.permute.xlu0 %688 }
 0x40c   : > { %692 = vst.msk [vmem:[#allocation2] sm:$0xf] %vm691_vm9, %v689_v48 }
 0x40d   : > { %755 = vst.msk [vmem:[#allocation2] sm:$0xf] %vm754_vm10, %v752_v8 }
 0x40e   : > { %818 = vst.msk [vmem:[#allocation2] sm:$0xf] %vm817_vm11, %v815_v49 }
 0x415   : > { %v819_v50 = vld [vmem:[#allocation2] sm:$0xf] }
 0x416   : > { %1007 = vmatmul.msk.bf16.vlgmr.msra.gmra.mxu0 %vm297_vm0, %v819_v50 }
 0x493   : > { %v852_v52 = vpop.f32.mrf.mxu0 }
 0x494   : > { %v853_v53 = vadd.f32 %v1116_v51, %v852_v52 }
 0x496   : > { %856 = vst.msk [vmem:[%s274_s29] sm:$0xff] %vm297_vm0, %v853_v53 }
 0x497   : > { %1266 = shalt.err (!%p1263_p9)
}
 0x498   : > { %1026 = dma.vmem_to_hbm [thread:$0]  (%p1444_p4), %s871_s30, 128, %s873_s16, %s858_s25  }
 0x49b   : > { %v854_v54 = vpop.f32.mrf.mxu0 }
 0x49c PF: > { %s884_s22 = sand.u32 1, %s1297_s18   ;;  %p1643_p10 = scmp.ge.s32.totalorder %s1309_s21, 2 }
 0x49d   : > { %s885_s10 = scalar_lea.sflag [#allocation5], %s884_s22 }
 0x49e   : > { %p1040_p13 = pnand %p1643_p10, %p1448_p6 }
 0x4a0   : > { %p1041_p11 = pneg %p1040_p13 }
 0x4a2   : > { %1292 = dma.done.wait (%p1041_p11), %s885_s10, 128  }
 0x4a3   : > { %1294 = vsyncadd (%p1041_p11), %s885_s10, 4294967168  ;;  %p19_p0 = scmp.ge.s32.totalorder %s1418_s12, 4   ;;  %s1644_s18 = smov %s1301_s19 }
 0x4a4   : > { %s1645_s19 = smov %s1305_s20  ;;  %s1646_s20 = smov %s1429_s15 }
 0x4a5   : > { %s1647_s21 = smov %s1418_s12  ;;  %21 = sbr.rel (!%p19_p0) target bundleno = 6 (0x6), region = 93 }
 0x4aa   :  { %891 = vsyncpa [#allocation4], 1 }
 0x4ab   :  { %893 = vsyncpa [#allocation4 + $0x1], 1 }
 0x4ac   :  { %894 = vsyncpa [#allocation7], 1 }
 0x4ad   :  { %895 = vsyncpa [#allocation5], 1 }
 0x4ae   :  { %897 = vsyncpa [#allocation5 + $0x1], 1 }

</bundles_post_ra>
